<compile_context>
chip_gen: v5e
topology: v5e:2x2
jax: 0.10.0
libtpu: 0.0.40
codegen_flags: <defaults>
</compile_context>

<pallas_src>
import functools

import jax
import jax.numpy as jnp
from jax.experimental import pallas as pl
from jax.experimental.pallas import tpu as pltpu

_LANE = 128
# Explicit scoped-VMEM limit: safe on every generation (physical VMEM per
# TensorCore is >= 64 MiB) and larger than the v5e 16 MiB default, so the
# bigger streaming tiles never hit a compile-time VMEM OOM.
_VMEM_LIMIT_BYTES = 32 * 1024 * 1024


def _cdiv(a, b):
    return -(-a // b)


def _round_up(a, m):
    return _cdiv(a, m) * m


# ---------------------------------------------------------------------------
# Kernels: one VPU add/mul + one EUP transcendental per element; fully hidden
# under the HBM DMAs on every generation.
# ---------------------------------------------------------------------------
def _log_kernel(y_ref, o_ref, *, eps, sign):
    x = jnp.log(y_ref[...].astype(jnp.float32) + eps)
    if sign != 1.0:          # static Python branch: negation folded in-kernel
        x = sign * x
    o_ref[...] = x.astype(o_ref.dtype)


def _log_both_kernel(y_ref, fwd_ref, neg_ref, *, eps):
    x = jnp.log(y_ref[...].astype(jnp.float32) + eps)
    fwd_ref[...] = x.astype(fwd_ref.dtype)
    neg_ref[...] = (-x).astype(neg_ref.dtype)


def _exp_kernel(x_ref, o_ref):
    o_ref[...] = jnp.exp(x_ref[...].astype(jnp.float32)).astype(o_ref.dtype)


# ---------------------------------------------------------------------------
# Tiling / wrapper machinery.
# ---------------------------------------------------------------------------
def _choose_lanes(n_main):
    """Widest multiple-of-128 lane width dividing n_main (n_main % 128 == 0)."""
    for w in (2048, 1024, 512, 256, 128):
        if n_main % w == 0:
            return w
    return _LANE


def _split_flat(y):
    """Flatten into a lane-dense (rows, lanes) slab plus a <128-element tail."""
    flat = y.reshape(-1)
    n = flat.size
    n_main = (n // _LANE) * _LANE
    if n_main == 0:
        return None, flat
    if n_main == n:
        main, tail = flat, None
    else:
        main, tail = flat[:n_main], flat[n_main:]
    lanes = _choose_lanes(n_main)
    return main.reshape(n_main // lanes, lanes), tail


def _grid_and_block(rows, lanes, itemsize, n_buffered_arrays):
    """Pick an (8,128)-aligned row block and a 1-D grid.

    Budget: half the scoped-VMEM limit split over the double-buffered
    input/output tiles.  For inputs > 1 MiB, keep the step count >= 2 and even
    so v7x's two TensorCores both get work (v5e/v6e, single TC, unaffected).
    """
    per_array = (_VMEM_LIMIT_BYTES // 2) // (2 * n_buffered_arrays)
    block_rows = max(8, (per_array // (lanes * itemsize)) // 8 * 8)

    total_bytes = rows * lanes * itemsize
    if total_bytes > (1 << 20) and rows >= 16:
        steps = _cdiv(rows, block_rows)
        if steps < 2 or steps % 2 == 1:
            target = max(2, steps + (steps % 2))
            block_rows = max(8, _round_up(_cdiv(rows, target), 8))

    if block_rows >= rows:
        return rows, (1,)          # single full-extent block
    return block_rows, (_cdiv(rows, block_rows),)   # ragged last block is masked


def _run_pallas(kernel, main2, out_dtypes):
    rows, lanes = main2.shape
    itemsize = max([main2.dtype.itemsize] + [jnp.dtype(d).itemsize for d in out_dtypes])
    n_out = len(out_dtypes)
    block_rows, grid = _grid_and_block(rows, lanes, itemsize, 1 + n_out)

    in_spec = pl.BlockSpec((block_rows, lanes), lambda i: (i, 0))
    out_shape = tuple(jax.ShapeDtypeStruct((rows, lanes), d) for d in out_dtypes)
    out_specs = tuple(pl.BlockSpec((block_rows, lanes), lambda i: (i, 0))
                      for _ in out_dtypes)
    if n_out == 1:
        out_shape, out_specs = out_shape[0], out_specs[0]

    return pl.pallas_call(
        kernel,
        out_shape=out_shape,
        grid=grid,
        in_specs=[in_spec],
        out_specs=out_specs,
        compiler_params=pltpu.CompilerParams(
            dimension_semantics=("parallel",),
            vmem_limit_bytes=_VMEM_LIMIT_BYTES,
        ),
    )(main2)


def _elementwise(kernel, tail_fn, y, out_dtypes):
    orig_shape = y.shape
    main2, tail = _split_flat(y)
    tails = tail_fn(tail) if tail is not None else None

    if main2 is None:   # fewer than 128 elements total -> plain jnp
        outs = tuple(t.reshape(orig_shape) for t in tails)
        return outs if len(outs) > 1 else outs[0]

    outs2 = _run_pallas(kernel, main2, out_dtypes)
    if len(out_dtypes) == 1:
        outs2 = (outs2,)

    results = []
    for i, o2 in enumerate(outs2):
        o = o2.reshape(-1)
        if tails is not None:
            o = jnp.concatenate([o, tails[i]])
        results.append(o.reshape(orig_shape))
    return tuple(results) if len(results) > 1 else results[0]


def _out_dtype(dtype):
    return dtype if jnp.issubdtype(dtype, jnp.floating) else jnp.float32


# ---------------------------------------------------------------------------
# Public API mirroring the PyTorch module.
# ---------------------------------------------------------------------------
def log_forward(y, *, eps=1e-12, sign=1.0):
    """Log.forward(y) = log(y + eps)  (sign=-1.0 gives the negated value)."""
    out_dtype = _out_dtype(y.dtype)
    kernel = functools.partial(_log_kernel, eps=float(eps), sign=float(sign))

    def tail_fn(t):
        v = jnp.log(t.astype(jnp.float32) + float(eps))
        return ((float(sign) * v).astype(out_dtype),)

    return _elementwise(kernel, tail_fn, y, (out_dtype,))


def log_abs_det_jacobian(y, *, eps=1e-12):
    """Log.log_abs_det_jacobian(y) = -log(y + eps); negation folded in-kernel."""
    return log_forward(y, eps=eps, sign=-1.0)


def log_forward_and_logdet(y, *, eps=1e-12):
    """Fused forward + log_abs_det_jacobian in one HBM pass (12 B/elem)."""
    out_dtype = _out_dtype(y.dtype)
    kernel = functools.partial(_log_both_kernel, eps=float(eps))

    def tail_fn(t):
        v = jnp.log(t.astype(jnp.float32) + float(eps))
        return (v.astype(out_dtype), (-v).astype(out_dtype))

    return _elementwise(kernel, tail_fn, y, (out_dtype, out_dtype))


def log_inv(x):
    """Log.inv(x) = exp(x)."""
    out_dtype = _out_dtype(x.dtype)

    def tail_fn(t):
        return (jnp.exp(t.astype(jnp.float32)).astype(out_dtype),)

    return _elementwise(_exp_kernel, tail_fn, x, (out_dtype,))


if __name__ == "__main__":
    eps = 1e-12
    key = jax.random.PRNGKey(0)

    # NCHW input, strictly positive (this module sits after a +c shift in the flow).
    y = jax.random.uniform(key, (2, 4, 16, 16), dtype=jnp.float32,
                           minval=0.1, maxval=5.0)

    x = log_forward(y, eps=eps)
    ld = log_abs_det_jacobian(y, eps=eps)
    xf, ldf = log_forward_and_logdet(y, eps=eps)
    y_rt = log_inv(x)
    jax.block_until_ready((x, ld, xf, ldf, y_rt))

    x_ref = jnp.log(y + eps)
    assert x.shape == y.shape and x.dtype == y.dtype
    assert jnp.allclose(x, x_ref, rtol=1e-6, atol=1e-6)
    assert jnp.allclose(ld, -x_ref, rtol=1e-6, atol=1e-6)
    assert jnp.allclose(xf, x_ref, rtol=1e-6, atol=1e-6)
    assert jnp.allclose(ldf, -x_ref, rtol=1e-6, atol=1e-6)
    assert jnp.allclose(y_rt, y, rtol=1e-5, atol=1e-5)

    # Ragged element count (not a multiple of 128): prefix-kernel + jnp tail path.
    y2 = jax.random.uniform(jax.random.PRNGKey(1), (3, 5, 7, 9), dtype=jnp.float32,
                            minval=0.1, maxval=5.0)
    x2 = log_forward(y2, eps=eps)
    jax.block_until_ready(x2)
    assert jnp.allclose(x2, jnp.log(y2 + eps), rtol=1e-6, atol=1e-6)

    # bf16 input: dtype preserved, compute stays f32 inside the kernel.
    yb = y.astype(jnp.bfloat16)
    xb = log_forward(yb, eps=eps)
    jax.block_until_ready(xb)
    assert xb.dtype == jnp.bfloat16
    assert jnp.allclose(xb.astype(jnp.float32),
                        jnp.log(yb.astype(jnp.float32) + eps),
                        rtol=2e-2, atol=2e-2)

    # Medium input (>1 MiB): exercises the multi-step grid (even step count for
    # v7x megacore) with a ragged, masked last row block.
    y3 = jax.random.uniform(jax.random.PRNGKey(2), (600, 1024), dtype=jnp.float32,
                            minval=0.1, maxval=5.0)
    x3, ld3 = log_forward_and_logdet(y3, eps=eps)
    jax.block_until_ready((x3, ld3))
    assert jnp.allclose(x3, jnp.log(y3 + eps), rtol=1e-6, atol=1e-6)
    assert jnp.allclose(ld3, -jnp.log(y3 + eps), rtol=1e-6, atol=1e-6)

    print("KERNEL_OK")
</pallas_src>

<mosaic_0001>
module attributes {stable_mosaic.version = 11 : i64} {
  func.func @_log_kernel(%arg0: i32, %arg1: memref<1x2048xf32, #tpu.memory_space<vmem>>, %arg2: memref<1x2048xf32, #tpu.memory_space<vmem>>) attributes {dimension_semantics = [#tpu.dimension_semantics<parallel>], iteration_bounds = array<i64: 1>, scalar_prefetch = 0 : i64, scratch_operands = 0 : i64, tpu.core_type = #tpu.core_type<tc>, window_params = [{transform_indices = @transform_0, window_bounds = array<i64: 1, 2048>}, {transform_indices = @transform_1, window_bounds = array<i64: 1, 2048>}]} {
    %c0 = arith.constant 0 : index
    %c0_0 = arith.constant 0 : index
    %0 = vector.load %arg1[%c0, %c0_0] : memref<1x2048xf32, #tpu.memory_space<vmem>>, vector<1x2048xf32>
    %cst = arith.constant 9.99999996E-13 : f32
    %1 = vector.broadcast %cst : f32 to vector<1x2048xf32>
    %2 = arith.addf %0, %1 : vector<1x2048xf32>
    %3 = math.log %2 : vector<1x2048xf32>
    %c0_1 = arith.constant 0 : index
    %c0_2 = arith.constant 0 : index
    %4 = vector.load %arg2[%c0_1, %c0_2] : memref<1x2048xf32, #tpu.memory_space<vmem>>, vector<1x2048xf32>
    tpu.vector_store %arg2[%c0_1, %c0_2], %3 {strides = array<i32>} : memref<1x2048xf32, #tpu.memory_space<vmem>>, vector<1x2048xf32>,
    return
  }
  func.func @transform_0(%arg0: i32) -> (i32, i32) {
    %c0_i32 = arith.constant 0 : i32
    %c0_i32_0 = arith.constant 0 : i32
    return %arg0, %c0_i32 : i32, i32
  }
  func.func @transform_1(%arg0: i32) -> (i32, i32) {
    %c0_i32 = arith.constant 0 : i32
    %c0_i32_0 = arith.constant 0 : i32
    return %arg0, %c0_i32 : i32, i32
  }
}

</mosaic_0001>

<bundles_post_ra>
// kernel: tpu_custom_call.1
= control target key start
LH: loop header
LB: loop body
LE: loop exit
PB: predicated region body
PF: predicated region fallthrough
CT: control target
= control target key end

     0   :  { %6 = vsyncpa [#allocation3], 0  ;;  %s126_s0 = inlined_call_operand.hbm [shape: f32[1,2048], index: 0, kind: input, shape index: {}]   ;;  %s127_s1 = inlined_call_operand.hbm [shape: f32[1,2048], index: 1, kind: output, shape index: {}]  }
   0x1   :  { %7 = vsyncpa [#allocation4], 0  ;;  %s13_s8 = sshll.u32 %s126_s0, 4  ;;  %s108_s9 = smov [#allocation2]   ;;  %s14_s8 = int_to_ptr.hbm [resolvable:$true] %s13_s8 }
   0x2   :  { %s15_s10 = sshll.u32 %s108_s9, 4  ;;  %s16_s10 = int_to_ptr.vmem [resolvable:$true] %s15_s10 }
   0x3   :  { %18 = dma.hbm_to_vmem [thread:$0]  %s14_s8, 256, %s16_s10, [#allocation3]  }
   0x4   :  { %104 = dma.done.wait [#allocation3], 256  }
   0x5   :  { %105 = vsyncadd [#allocation3], 4294967040  ;;  %v23_v0 = vld [vmem:[#allocation2] sm:$0xff]  ;;  %v24_v1 = vld [vmem:[#allocation2 + $0x8] sm:$0xff]  ;;  %s109_s11 = smov [#allocation5]   ;;  %s40_s15 = sshll.u32 %s127_s1, 4  ;;  %s41_s15 = int_to_ptr.hbm [resolvable:$true] %s40_s15 }
   0x6   :  { %v25_v2 = vadd.f32 1e-12, %v23_v0  ;;  %v26_v3 = vadd.f32 1e-12, %v24_v1  ;;  %s38_s12 = sshll.u32 %s109_s11, 4  ;;  %s39_s12 = int_to_ptr.vmem [resolvable:$true] %s38_s12 }
   0x8   :  { %52 = vlog2.f32 %v25_v2 }
   0x9   :  { %54 = vlog2.f32 %v26_v3 }
   0xe   :  { %v53_v4 = vpop.eup %52 }
   0xf   :  { %v55_v5 = vpop.eup %54  ;;  %v28_v6 = vmul.f32 0.6931472, %v53_v4 }
  0x10   :  { %v30_v7 = vmul.f32 0.6931472, %v55_v5 }
  0x11   :  { %31 = vst [vmem:[#allocation5] sm:$0xff] %v28_v6 }
  0x12   :  { %32 = vst [vmem:[#allocation5 + $0x8] sm:$0xff] %v30_v7 }
  0x13   :  { %43 = dma.vmem_to_hbm [thread:$0]  %s39_s12, 256, %s41_s15, [#allocation4]  }
  0x14   :  { %106 = dma.done.wait [#allocation4], 256  }
  0x15   :  { %107 = vsyncadd [#allocation4], 4294967040 }
  0x16   :  { %48 = vsyncpa [#allocation3], 1 }
  0x17   :  { %49 = vsyncpa [#allocation4], 1 }

</bundles_post_ra>
